<compile_context>
chip_gen: v7x
topology: tpu7x:2x2x1
jax: 0.10.0
libtpu: 0.0.40
codegen_flags: <defaults>
</compile_context>

<pallas_src>
import math

import jax
import jax.numpy as jnp
from jax.experimental import pallas as pl
from jax.experimental.pallas import tpu as pltpu

_MIB = 1024 * 1024
_LANE_CANDIDATES = (8192, 4096, 2048, 1024, 512, 256, 128)  # widest-first


def _cast_kernel(x_ref, o_ref):
    # double -> bool -> uint8  ==  (x != 0) as uint8 (no redundant f64/f32 hop).
    o_ref[...] = (x_ref[...] != 0).astype(jnp.uint8)


def _vmem_budget_bytes():
    """Double-buffered (input + uint8 output) working-set target per grid step."""
    try:
        kind = jax.devices()[0].device_kind.lower()
    except Exception:  # pragma: no cover - defensive; fall back to safe budget
        kind = ""
    if "v5" in kind:
        return 10 * _MIB   # ~4 MiB f32 input tile; fits v5e's 16 MiB scoped default
    return 20 * _MIB       # ~8 MiB f32 input tile; fits v6e/v7x 32 MiB scoped default


def _pick_lane(n):
    """Widest lane width (multiple of 128) dividing n, preferring >= 8 rows."""
    divisors = [c for c in _LANE_CANDIDATES if n % c == 0]
    if not divisors:
        return None
    for c in divisors:            # prefer sublane-dense vregs (>= 8 rows)
        if n // c >= 8:
            return c
    return divisors[0]


def _pick_tile_rows(rows, lane, itemsize, budget_bytes):
    """Row tile: multiple of 32, sized to the VMEM budget, >= 2 steps when rows >= 64."""
    if rows <= 32:
        return rows  # single full-extent block (always a legal block shape)
    tile_elems = budget_bytes // (2 * (itemsize + 1))  # 2x (input + uint8 output)
    tile_r = max(32, (tile_elems // lane) // 32 * 32)
    if rows >= 64:
        # Keep at least 2 grid steps so v7x can shard across both TensorCores.
        half = -(-rows // 2)
        half = -(-half // 32) * 32
        tile_r = min(tile_r, half)
    tile_r = max(32, min(tile_r, (rows // 32) * 32))
    # Prefer a tile that divides rows exactly (avoids a masked final block).
    if rows % tile_r != 0:
        for cand in range(tile_r, max(32, tile_r // 2) - 1, -32):
            if rows % cand == 0:
                tile_r = cand
                break
    return tile_r


def _run_cast_2d(x2d, tile_r):
    rows, lane = x2d.shape
    return pl.pallas_call(
        _cast_kernel,
        out_shape=jax.ShapeDtypeStruct((rows, lane), jnp.uint8),
        grid=(pl.cdiv(rows, tile_r),),
        in_specs=[pl.BlockSpec((tile_r, lane), lambda i: (i, 0))],
        out_specs=pl.BlockSpec((tile_r, lane), lambda i: (i, 0)),
        compiler_params=pltpu.CompilerParams(
            dimension_semantics=("parallel",),
        ),
    )(x2d)


def fcast_test(x):
    """Pallas equivalent of FCastTest.forward. Accepts any shape; returns uint8."""
    orig_shape = x.shape
    n = math.prod(orig_shape) if orig_shape else 1
    flat = x.reshape(-1)
    itemsize = jnp.dtype(x.dtype).itemsize
    budget = _vmem_budget_bytes()

    lane = _pick_lane(n)
    if lane is not None:
        rows = n // lane
        tile_r = _pick_tile_rows(rows, lane, itemsize, budget)
        out2d = _run_cast_2d(flat.reshape(rows, lane), tile_r)
        return out2d.reshape(orig_shape)

    # Ragged element count (n % 128 != 0): process the 128-divisible bulk with
    # the tiled kernel and the < 128-element tail with a tiny single-block
    # call. Avoids the full-array pad + [:n] slice HBM round trips.
    lane = 128
    bulk_n = (n // lane) * lane
    rem = n - bulk_n
    pieces = []
    if bulk_n:
        rows = bulk_n // lane
        tile_r = _pick_tile_rows(rows, lane, itemsize, budget)
        bulk_out = _run_cast_2d(flat[:bulk_n].reshape(rows, lane), tile_r)
        pieces.append(bulk_out.reshape(-1))
    if rem:
        tail2d = flat[bulk_n:].reshape(1, rem)
        tail_out = pl.pallas_call(
            _cast_kernel,
            out_shape=jax.ShapeDtypeStruct((1, rem), jnp.uint8),
        )(tail2d)
        pieces.append(tail_out.reshape(-1))
    out = pieces[0] if len(pieces) == 1 else jnp.concatenate(pieces)
    return out.reshape(orig_shape)


if __name__ == "__main__":
    key = jax.random.PRNGKey(0)
    k_val, k_mask = jax.random.split(key)
    # NCHW input consistent with a typical test tensor.
    x = jax.random.normal(k_val, (2, 4, 16, 16), dtype=jnp.float32)
    # Sprinkle in exact zeros so both branches of the bool cast are exercised.
    x = x * (jax.random.uniform(k_mask, x.shape) > 0.2)

    out = fcast_test(x)
    out = jax.block_until_ready(out)

    # Reference check in plain JAX.
    ref = (x != 0).astype(jnp.uint8)
    assert out.dtype == jnp.uint8
    assert out.shape == x.shape
    assert bool(jnp.all(out == ref))
    print("KERNEL_OK")
</pallas_src>

<mosaic_0001>
module attributes {stable_mosaic.version = 11 : i64} {
  func.func @_cast_kernel(%arg0: i32, %arg1: memref<8x256xf32, #tpu.memory_space<vmem>>, %arg2: memref<8x256xi8, #tpu.memory_space<vmem>>) attributes {dimension_semantics = [#tpu.dimension_semantics<parallel>], iteration_bounds = array<i64: 1>, scalar_prefetch = 0 : i64, scratch_operands = 0 : i64, tpu.core_type = #tpu.core_type<tc>, window_params = [{transform_indices = @transform_0, window_bounds = array<i64: 8, 256>}, {transform_indices = @transform_1, window_bounds = array<i64: 8, 256>}]} {
    %c0 = arith.constant 0 : index
    %c0_0 = arith.constant 0 : index
    %0 = vector.load %arg1[%c0, %c0_0] : memref<8x256xf32, #tpu.memory_space<vmem>>, vector<8x256xf32>
    %cst = arith.constant 0.000000e+00 : f32
    %1 = vector.broadcast %cst : f32 to vector<8x256xf32>
    %2 = arith.cmpf one, %0, %1 : vector<8x256xf32>
    %3 = arith.extui %2 : vector<8x256xi1> to vector<8x256xi8>
    %c0_1 = arith.constant 0 : index
    %c0_2 = arith.constant 0 : index
    %4 = vector.load %arg2[%c0_1, %c0_2] : memref<8x256xi8, #tpu.memory_space<vmem>>, vector<8x256xi8>
    tpu.vector_store %arg2[%c0_1, %c0_2], %3 {strides = array<i32>} : memref<8x256xi8, #tpu.memory_space<vmem>>, vector<8x256xi8>,
    return
  }
  func.func @transform_0(%arg0: i32) -> (i32, i32) {
    %c0_i32 = arith.constant 0 : i32
    %c0_i32_0 = arith.constant 0 : i32
    return %arg0, %c0_i32 : i32, i32
  }
  func.func @transform_1(%arg0: i32) -> (i32, i32) {
    %c0_i32 = arith.constant 0 : i32
    %c0_i32_0 = arith.constant 0 : i32
    return %arg0, %c0_i32 : i32, i32
  }
}

</mosaic_0001>

<bundles_post_ra>
// kernel: tpu_custom_call.1
= control target key start
LH: loop header
LB: loop body
LE: loop exit
PB: predicated region body
PF: predicated region fallthrough
CT: control target
= control target key end

     0   :  { %6 = vsyncpa [#allocation3], 0  ;;  %s141_s0 = inlined_call_operand.hbm [shape: f32[8,256], index: 0, kind: input, shape index: {}]   ;;  %s142_s1 = inlined_call_operand.hbm [shape: u8[8,256], index: 1, kind: output, shape index: {}]  }
   0x1   :  { %7 = vsyncpa [#allocation4], 0  ;;  %s104_s6 = smov [#allocation2]   ;;  %s56_s10 = scalar_lea.hbm %s141_s0, 256 }
   0x2   :  { %s14_s7 = sshll.u32 %s104_s6, 4  ;;  %p57_p0 = scmp.ne.s32.totalorder %s141_s0, %s56_s10  ;;  %s15_s7 = int_to_ptr.vmem [resolvable:$true] %s14_s7 }
   0x3   :  { %p60_p1 = scmp.lt.u32.totalorder %s56_s10, %s141_s0 }
   0x5   :  { %p62_p2 = pnand %p60_p1, %p57_p0 }
   0x7   :  { %65 = shalt.err (!%p62_p2)
}
   0x8   :  { %s66_s15 = scalar_lea.vmem %s15_s7, 256  ;;  %p71_p4 = scmp.lt.s32.totalorder %s15_s7, %s15_s7 }
   0x9   :  { %p67_p3 = scmp.ne.s32.totalorder %s15_s7, %s66_s15  ;;  %p72_p5 = scmp.lt.s32.totalorder %s66_s15, %s66_s15 }
   0xb   :  { %p73_p6 = por %p72_p5, %p71_p4 }
   0xd   :  { %p74_p7 = pnand %p73_p6, %p67_p3 }
   0xf   :  { %77 = shalt.err (!%p74_p7)
}
  0x10   :  { %17 = dma.hbm_to_vmem [thread:$0]  %s141_s0, 256, %s15_s7, [#allocation3]  }
  0x11   :  { %100 = dma.done.wait [#allocation3], 256  }
  0x12   :  { %101 = vsyncadd [#allocation3], 4294967040  ;;  %v23_v0 = vld [vmem:[#allocation2] sm:$0xff]  ;;  %v24_v1 = vld [vmem:[#allocation2 + $0x8] sm:$0xff]  ;;  %v105_v2 = vmov 0   ;;  %s106_s18 = smov [#allocation5]  }
  0x13   :  { %vm25_vm0 = vcmp.ne.f32.partialorder %v23_v0, 0.0  ;;  %vm26_vm1 = vcmp.ne.f32.partialorder %v24_v1, 0.0  ;;  %s44_s19 = sshll.u32 %s106_s18, 4  ;;  %s45_s19 = int_to_ptr.vmem [resolvable:$true] %s44_s19 }
  0x14   :  { %vm27_vm2 = vmpackc.low %vm25_vm0, %vm25_vm0  ;;  %s78_s0 = scalar_lea.vmem %s45_s19, 64  ;;  %p83_p9 = scmp.lt.s32.totalorder %s45_s19, %s45_s19 }
  0x15   :  { %vm28_vm3 = vmpackc.even %vm27_vm2, %vm27_vm2  ;;  %p79_p8 = scmp.ne.s32.totalorder %s45_s19, %s78_s0  ;;  %p84_p10 = scmp.lt.s32.totalorder %s78_s0, %s78_s0 }
  0x16   :  { %vm29_vm4 = vmpackc.low %vm26_vm1, %vm26_vm1  ;;  %v31_v3 = vsel %vm28_vm3, 16843009, %v105_v2 }
  0x17   :  { %vm30_vm5 = vmpackc.even %vm29_vm4, %vm29_vm4  ;;  %v33_v4 = vunpack.c.0.s8 %v31_v3  ;;  %p85_p11 = por %p84_p10, %p83_p9 }
  0x18   :  { %v32_v5 = vsel %vm30_vm5, 16843009, %v105_v2 }
  0x19   :  { %v34_v6 = vunpack.c.0.s8 %v32_v5  ;;  %p86_p12 = pnand %p85_p11, %p79_p8 }
  0x1b   :  { %v35_v7 = vpack.c.b16 %v34_v6, %v33_v4 }
  0x1d   :  { %v36_v8 = vpack.c.b8 %v35_v7, %v35_v7 }
  0x1f   :  { %37 = vst [vmem:[#allocation5] sm:$0xf] %v36_v8 }
  0x20   :  { %89 = shalt.err (!%p86_p12)
}
  0x21   :  { %s90_s22 = scalar_lea.hbm %s142_s1, 64 }
  0x22   :  { %p91_p13 = scmp.ne.s32.totalorder %s142_s1, %s90_s22  ;;  %p94_p0 = scmp.lt.u32.totalorder %s90_s22, %s142_s1 }
  0x24   :  { %p96_p1 = pnand %p94_p0, %p91_p13 }
  0x26   :  { %99 = shalt.err (!%p96_p1)
}
  0x27   :  { %47 = dma.vmem_to_hbm [thread:$0]  %s45_s19, 64, %s142_s1, [#allocation4]  }
  0x28   :  { %102 = dma.done.wait [#allocation4], 64  }
  0x29   :  { %103 = vsyncadd [#allocation4], 4294967232 }
  0x2a   :  { %51 = vsyncpa [#allocation3], 1 }
  0x2b   :  { %52 = vsyncpa [#allocation4], 1 }

</bundles_post_ra>
